<compile_context>
chip_gen: v7x
topology: tpu7x:2x2x1
jax: 0.10.0
libtpu: 0.0.40
codegen_flags: <defaults>
</compile_context>

<pallas_src>
import functools

import jax
import jax.numpy as jnp
from jax import lax
from jax.experimental import pallas as pl
from jax.experimental.pallas import tpu as pltpu


_NEG_INF = -1e30


@functools.lru_cache(maxsize=None)
def _vmem_limit_bytes():
    cap = 64 * 1024 * 1024
    try:
        cap = int(pltpu.get_tpu_info().vmem_capacity_bytes)
    except Exception:
        pass
    # ~96 MiB on 128 MiB parts (v5e/v6e), ~48 MiB on 64 MiB parts (v7x).
    return min((cap * 3) // 4, 100 * 1024 * 1024)


def _cparams(dim_sem):
    return pltpu.CompilerParams(dimension_semantics=dim_sem,
                                vmem_limit_bytes=_vmem_limit_bytes())


def _pick_tile(n_pad, cap):
    """Largest multiple-of-128 divisor of n_pad, capped at `cap`."""
    t = min(cap, n_pad)
    t = (t // 128) * 128
    while t > 128 and (n_pad % t) != 0:
        t -= 128
    return max(t, 128)


# -----------------------------------------------------------------------------
# GAT stage 1: per (metapath, node-tile) projection + attention scores.
#   emb = h @ W_ext, where W_ext = [W | Wl | Wr]  ->  feat = emb[:, :HF] (bf16),
#   scores = emb[:, HF:] = [el | er] (f32).  Single MXU matmul per tile.
# -----------------------------------------------------------------------------
def gat_project_kernel(h_ref, w_ref, feat_ref, score_ref, *, hf):
    emb = jnp.dot(h_ref[...], w_ref[...], preferred_element_type=jnp.float32)
    feat_ref[...] = emb[:, :hf].astype(jnp.bfloat16)
    score_ref[...] = emb[:, hf:]


def gat_project(h_bf16, w_ext_bf16, *, hf, tile=None):
    """h: (Npad, Fin) bf16; W_ext: (P, Fin, HF + 2H) bf16."""
    P, Fin, tot = w_ext_bf16.shape
    two_h = tot - hf
    n_pad = h_bf16.shape[0]
    tile = tile or _pick_tile(n_pad, 512)
    n_tiles = n_pad // tile
    kernel = functools.partial(gat_project_kernel, hf=hf)
    return pl.pallas_call(
        kernel,
        out_shape=(
            jax.ShapeDtypeStruct((P, n_pad, hf), jnp.bfloat16),
            jax.ShapeDtypeStruct((P, n_pad, two_h), jnp.float32),
        ),
        grid=(P, n_tiles),
        in_specs=[
            pl.BlockSpec((tile, Fin), lambda p, i: (i, 0)),
            pl.BlockSpec((None, Fin, tot), lambda p, i: (p, 0, 0)),
        ],
        out_specs=(
            pl.BlockSpec((None, tile, hf), lambda p, i: (p, i, 0)),
            pl.BlockSpec((None, tile, two_h), lambda p, i: (p, i, 0)),
        ),
        compiler_params=_cparams(("parallel", "parallel")),
    )(h_bf16, w_ext_bf16)


# -----------------------------------------------------------------------------
# GAT stage 2: per (metapath, dst-node-tile) masked edge softmax + aggregation.
# adj_t is dst-major: adj_t[p, v, u] = 1 iff edge u -> v.
# Deferred normalization: aggregate unnormalized exp-weights, then scale the small
# (TN, F) result by the approximate reciprocal of the denominator (EUP slot).
# -----------------------------------------------------------------------------
def gat_attend_kernel(adj_ref, feat_ref, elt_ref, er_ref, out_ref,
                      *, num_heads, out_feats):
    adj = adj_ref[...]                                  # (TD, Ns) bf16
    mask = adj > 0                                      # hoisted once across heads
    has_in = jnp.max(adj, axis=-1, keepdims=True) > 0   # (TD, 1) zero-in-degree guard
    feat = feat_ref[...]                                # (Ns, HF) bf16
    elt = elt_ref[...]                                  # (H, Ns)  f32 (src scores on lanes)
    er = er_ref[...]                                    # (TD, H)  f32 (dst scores)

    for hd in range(num_heads):
        e = er[:, hd:hd + 1] + elt[hd:hd + 1, :]        # (TD, Ns): dst x src
        e = jnp.where(e > 0, e, 0.2 * e)                # leaky_relu(0.2)
        e = jnp.where(mask, e, _NEG_INF)
        m = jnp.max(e, axis=-1, keepdims=True)          # softmax over sources
        p = jnp.exp(e - m)                              # masked entries underflow to 0
        denom = jnp.sum(p, axis=-1, keepdims=True)
        feat_h = feat[:, hd * out_feats:(hd + 1) * out_feats]
        rst = jnp.dot(p.astype(jnp.bfloat16), feat_h,
                      preferred_element_type=jnp.float32)          # (TD, F) unnormalized
        scale = jnp.where(has_in, pl.reciprocal(denom, approx=True), 0.0)
        rst = rst * scale                                           # zero-in-degree -> 0
        # overflow-safe ELU
        rst = jnp.where(rst > 0, rst, jnp.exp(jnp.minimum(rst, 0.0)) - 1.0)
        out_ref[:, hd * out_feats:(hd + 1) * out_feats] = rst.astype(out_ref.dtype)


def gat_attend(adj_t, feat, el_t, er, *, num_heads, out_feats, tile=None):
    P, n_pad, _ = adj_t.shape
    HF = feat.shape[-1]
    tile = tile or _pick_tile(n_pad, 256)
    n_tiles = n_pad // tile
    kernel = functools.partial(gat_attend_kernel,
                               num_heads=num_heads, out_feats=out_feats)
    return pl.pallas_call(
        kernel,
        out_shape=jax.ShapeDtypeStruct((P, n_pad, HF), jnp.bfloat16),
        grid=(P, n_tiles),
        in_specs=[
            pl.BlockSpec((None, tile, n_pad), lambda p, j: (p, j, 0)),       # adj tile
            pl.BlockSpec((None, n_pad, HF), lambda p, j: (p, 0, 0)),         # feat (resident per p)
            pl.BlockSpec((None, num_heads, n_pad), lambda p, j: (p, 0, 0)),  # el_t (resident per p)
            pl.BlockSpec((None, tile, num_heads), lambda p, j: (p, j, 0)),   # er tile
        ],
        out_specs=pl.BlockSpec((None, tile, HF), lambda p, j: (p, j, 0)),
        compiler_params=_cparams(("parallel", "parallel")),
    )(adj_t, feat, el_t, er)


def gat_forward(h_bf16, w_ext_bf16, adj_t, *, num_heads, out_feats):
    hf = num_heads * out_feats
    feat, scores = gat_project(h_bf16, w_ext_bf16, hf=hf)
    # Tiny layout plumbing (P*N*H f32): src-side scores with nodes on the lane axis.
    el_t = jnp.swapaxes(scores[..., :num_heads], 1, 2)      # (P, H, Npad)
    er = scores[..., num_heads:]                            # (P, Npad, H)
    return gat_attend(adj_t, feat, el_t, er,
                      num_heads=num_heads, out_feats=out_feats)


# -----------------------------------------------------------------------------
# Semantic attention, pass 1: per-metapath column-sum of tanh(z @ W1 + b1),
# tiled over nodes with an accumulator output (padded rows masked out).
# -----------------------------------------------------------------------------
def sem_reduce_kernel(z_ref, w1_ref, b1_ref, acc_ref, *, tile, n_real):
    @pl.when(pl.program_id(1) == 0)
    def _():
        acc_ref[...] = jnp.zeros_like(acc_ref)

    z = z_ref[...]                                           # (tile, D) bf16
    s = jnp.tanh(jnp.dot(z, w1_ref[...], preferred_element_type=jnp.float32)
                 + b1_ref[...])                              # (tile, Hs) f32
    row = lax.broadcasted_iota(jnp.int32, (tile, 1), 0) + pl.program_id(1) * tile
    s = jnp.where(row < n_real, s, 0.0)                      # drop padded rows
    acc_ref[...] += jnp.sum(s, axis=0, keepdims=True)        # (1, Hs)


def sem_reduce(z, w1_bf16, b1, *, n_real, tile=None):
    P, n_pad, D = z.shape
    Hs = w1_bf16.shape[-1]
    tile = tile or _pick_tile(n_pad, 512)
    n_tiles = n_pad // tile
    kernel = functools.partial(sem_reduce_kernel, tile=tile, n_real=n_real)
    return pl.pallas_call(
        kernel,
        out_shape=jax.ShapeDtypeStruct((P, 1, Hs), jnp.float32),
        grid=(P, n_tiles),
        in_specs=[
            pl.BlockSpec((None, tile, D), lambda p, j: (p, j, 0)),
            pl.BlockSpec((D, Hs), lambda p, j: (0, 0)),
            pl.BlockSpec((1, Hs), lambda p, j: (0, 0)),
        ],
        out_specs=pl.BlockSpec((None, 1, Hs), lambda p, j: (p, 0, 0)),
        compiler_params=_cparams(("parallel", "arbitrary")),
    )(z, w1_bf16, b1)


# -----------------------------------------------------------------------------
# Semantic attention, pass 2: out[tile] = sum_p beta[p] * z[p, tile].
# beta (P-way softmax) is precomputed wrapper-side (hoisted out of the tile loop).
# -----------------------------------------------------------------------------
def sem_combine_kernel(z_ref, beta_ref, out_ref, *, num_paths):
    acc = jnp.zeros(out_ref.shape, jnp.float32)
    for p in range(num_paths):
        acc = acc + beta_ref[p] * z_ref[p].astype(jnp.float32)   # (1,1)*(tile,D)
    out_ref[...] = acc


def sem_combine(z, beta, *, tile=None):
    P, n_pad, D = z.shape
    tile = tile or _pick_tile(n_pad, 512)
    n_tiles = n_pad // tile
    kernel = functools.partial(sem_combine_kernel, num_paths=P)
    return pl.pallas_call(
        kernel,
        out_shape=jax.ShapeDtypeStruct((n_pad, D), jnp.float32),
        grid=(n_tiles,),
        in_specs=[
            pl.BlockSpec((P, tile, D), lambda j: (0, j, 0)),
            pl.BlockSpec((P, 1, 1), lambda j: (0, 0, 0)),
        ],
        out_specs=pl.BlockSpec((tile, D), lambda j: (j, 0)),
        compiler_params=_cparams(("parallel",)),
    )(z, beta)


# -----------------------------------------------------------------------------
# Parameter construction (deterministic, synthetic) and full HAN forward.
# -----------------------------------------------------------------------------
def init_han_params(key, *, num_metapaths, in_size, hidden_size, out_size,
                    num_heads, sem_hidden=128):
    params = {"layers": []}
    cur_in = in_size
    for H in num_heads:
        key, kW, kal, kar, kw1, kb1, kw2 = jax.random.split(key, 7)
        HF = H * hidden_size
        W = 0.1 * jax.random.normal(kW, (num_metapaths, cur_in, HF), jnp.float32)
        al = 0.1 * jax.random.normal(kal, (num_metapaths, H, hidden_size), jnp.float32)
        ar = 0.1 * jax.random.normal(kar, (num_metapaths, H, hidden_size), jnp.float32)
        # Fold the attention-score matmul into the projection (scores are linear in feat):
        # el = feat_h . attn_l[h]  ==  h @ (W_h @ attn_l[h]).
        W4 = W.reshape(num_metapaths, cur_in, H, hidden_size)
        Wl = jnp.einsum("pdhf,phf->pdh", W4, al)             # (P, cur_in, H)
        Wr = jnp.einsum("pdhf,phf->pdh", W4, ar)             # (P, cur_in, H)
        W_ext = jnp.concatenate([W, Wl, Wr], axis=-1)        # (P, cur_in, HF + 2H)
        layer = {
            "W_ext": W_ext.astype(jnp.bfloat16),
            "sem_w1": (0.1 * jax.random.normal(kw1, (HF, sem_hidden),
                                               jnp.float32)).astype(jnp.bfloat16),
            "sem_b1": 0.1 * jax.random.normal(kb1, (1, sem_hidden), jnp.float32),
            "sem_w2_row": 0.1 * jax.random.normal(kw2, (1, sem_hidden), jnp.float32),
            "num_heads": H,
            "out_feats": hidden_size,
        }
        params["layers"].append(layer)
        cur_in = HF
    # self.predict exists in __init__ but is NOT applied in HAN.forward; kept for parity.
    key, kp = jax.random.split(key)
    params["predict_W"] = 0.1 * jax.random.normal(kp, (cur_in, out_size), jnp.float32)
    params["predict_b"] = jnp.zeros((out_size,), jnp.float32)
    return params


def han_forward(params, h, adj):
    """h: (N, in_size) f32; adj: (P, N, N) with adj[p, u, v] = 1 for edge u -> v."""
    N = h.shape[0]
    n_pad = ((N + 127) // 128) * 128
    pad = n_pad - N

    # dst-major adjacency mask in bf16 (adj_t[p, v, u] = edge u -> v); zero-padded rows
    # have zero in-degree and produce all-zero outputs.
    adj_t = jnp.swapaxes(adj, 1, 2).astype(jnp.bfloat16)
    if pad:
        adj_t = jnp.pad(adj_t, ((0, 0), (0, pad), (0, pad)))
        h = jnp.pad(h, ((0, pad), (0, 0)))

    for layer in params["layers"]:
        z = gat_forward(h.astype(jnp.bfloat16), layer["W_ext"], adj_t,
                        num_heads=layer["num_heads"],
                        out_feats=layer["out_feats"])                 # (P, Npad, HF) bf16
        colsum = sem_reduce(z, layer["sem_w1"], layer["sem_b1"], n_real=N)  # (P, 1, Hs)
        # Hoisted semantic-attention softmax over the P metapaths (tiny XLA op):
        w = jnp.sum(colsum[:, 0, :] * layer["sem_w2_row"][0], axis=-1) / float(N)   # (P,)
        beta = jax.nn.softmax(w).reshape(-1, 1, 1).astype(jnp.float32)
        h = sem_combine(z, beta)                                      # (Npad, HF) f32
    return h[:N]   # predict layer intentionally not applied (matches torch forward)


if __name__ == "__main__":
    key = jax.random.PRNGKey(0)

    # Small, deterministic synthetic problem (N not a multiple of the tile on purpose).
    N = 200           # number of nodes
    P = 3             # number of metapaths
    IN_SIZE = 64
    HIDDEN = 16
    OUT_SIZE = 8
    NUM_HEADS = [4, 4]

    key, kh, kadj = jax.random.split(key, 3)
    h = jax.random.normal(kh, (N, IN_SIZE), jnp.float32)

    # Dense per-metapath adjacency (stand-in for dgl.metapath_reachable_graph),
    # with self-loops so every node has at least one incoming edge.
    rand = jax.random.uniform(kadj, (P, N, N))
    adj = (rand < 0.15).astype(jnp.float32)
    adj = jnp.maximum(adj, jnp.broadcast_to(jnp.eye(N, dtype=jnp.float32), (P, N, N)))

    params = init_han_params(key, num_metapaths=P, in_size=IN_SIZE,
                             hidden_size=HIDDEN, out_size=OUT_SIZE,
                             num_heads=NUM_HEADS)

    out = han_forward(params, h, adj)
    out = jax.block_until_ready(out)
    assert out.shape == (N, HIDDEN * NUM_HEADS[-1]), out.shape
    assert bool(jnp.all(jnp.isfinite(out)))
    print("KERNEL_OK")
</pallas_src>

<mosaic_0001>
module attributes {stable_mosaic.version = 11 : i64} {
  func.func @gat_project_kernel(%arg0: i32, %arg1: i32, %arg2: memref<256x64xbf16, #tpu.memory_space<vmem>>, %arg3: memref<1x64x72xbf16, #tpu.memory_space<vmem>>, %arg4: memref<1x256x64xbf16, #tpu.memory_space<vmem>>, %arg5: memref<1x256x8xf32, #tpu.memory_space<vmem>>) attributes {dimension_semantics = [#tpu.dimension_semantics<parallel>, #tpu.dimension_semantics<parallel>], iteration_bounds = array<i64: 3, 1>, scalar_prefetch = 0 : i64, scratch_operands = 0 : i64, tpu.core_type = #tpu.core_type<tc>, window_params = [{transform_indices = @transform_0, window_bounds = array<i64: 256, 64>}, {transform_indices = @transform_1, window_bounds = array<i64: 1, 64, 72>}, {transform_indices = @transform_2, window_bounds = array<i64: 1, 256, 64>}, {transform_indices = @transform_3, window_bounds = array<i64: 1, 256, 8>}]} {
    %c0 = arith.constant 0 : index
    %c0_0 = arith.constant 0 : index
    %0 = vector.load %arg2[%c0, %c0_0] : memref<256x64xbf16, #tpu.memory_space<vmem>>, vector<256x64xbf16>
    %c0_1 = arith.constant 0 : index
    %c0_2 = arith.constant 0 : index
    %c0_3 = arith.constant 0 : index
    %1 = vector.load %arg3[%c0_1, %c0_2, %c0_3] : memref<1x64x72xbf16, #tpu.memory_space<vmem>>, vector<1x64x72xbf16>
    %2 = vector.shape_cast %1 : vector<1x64x72xbf16> to vector<64x72xbf16>
    %cst = arith.constant dense<0.000000e+00> : vector<256x72xf32>
    %3 = tpu.matmul %0, %2, %cst {dimension_numbers = #tpu.dot_dimension_numbers<[1], [0], [0], [1], [0, 0, 1, 1], [], []>} : vector<256x64xbf16>, vector<64x72xbf16>, vector<256x72xf32> -> vector<256x72xf32>
    %4 = vector.extract_strided_slice %3 {offsets = [0, 0], sizes = [256, 64], strides = [1, 1]} : vector<256x72xf32> to vector<256x64xf32>
    %5 = arith.truncf %4 : vector<256x64xf32> to vector<256x64xbf16>
    %c0_4 = arith.constant 0 : index
    %c0_5 = arith.constant 0 : index
    %c0_6 = arith.constant 0 : index
    %6 = vector.load %arg4[%c0_4, %c0_5, %c0_6] : memref<1x256x64xbf16, #tpu.memory_space<vmem>>, vector<1x256x64xbf16>
    %7 = vector.shape_cast %6 : vector<1x256x64xbf16> to vector<256x64xbf16>
    %8 = vector.shape_cast %5 : vector<256x64xbf16> to vector<1x256x64xbf16>
    tpu.vector_store %arg4[%c0_4, %c0_5, %c0_6], %8 {strides = array<i32>} : memref<1x256x64xbf16, #tpu.memory_space<vmem>>, vector<1x256x64xbf16>,
    %9 = vector.extract_strided_slice %3 {offsets = [0, 64], sizes = [256, 8], strides = [1, 1]} : vector<256x72xf32> to vector<256x8xf32>
    %c0_7 = arith.constant 0 : index
    %c0_8 = arith.constant 0 : index
    %c0_9 = arith.constant 0 : index
    %10 = vector.load %arg5[%c0_7, %c0_8, %c0_9] : memref<1x256x8xf32, #tpu.memory_space<vmem>>, vector<1x256x8xf32>
    %11 = vector.shape_cast %10 : vector<1x256x8xf32> to vector<256x8xf32>
    %12 = vector.shape_cast %9 : vector<256x8xf32> to vector<1x256x8xf32>
    tpu.vector_store %arg5[%c0_7, %c0_8, %c0_9], %12 {strides = array<i32>} : memref<1x256x8xf32, #tpu.memory_space<vmem>>, vector<1x256x8xf32>,
    return
  }
  func.func @transform_0(%arg0: i32, %arg1: i32) -> (i32, i32) {
    %c0_i32 = arith.constant 0 : i32
    %c0_i32_0 = arith.constant 0 : i32
    return %arg1, %c0_i32 : i32, i32
  }
  func.func @transform_1(%arg0: i32, %arg1: i32) -> (i32, i32, i32) {
    %c0_i32 = arith.constant 0 : i32
    %c0_i32_0 = arith.constant 0 : i32
    %c0_i32_1 = arith.constant 0 : i32
    return %arg0, %c0_i32, %c0_i32_0 : i32, i32, i32
  }
  func.func @transform_2(%arg0: i32, %arg1: i32) -> (i32, i32, i32) {
    %c0_i32 = arith.constant 0 : i32
    %c0_i32_0 = arith.constant 0 : i32
    return %arg0, %arg1, %c0_i32 : i32, i32, i32
  }
  func.func @transform_3(%arg0: i32, %arg1: i32) -> (i32, i32, i32) {
    %c0_i32 = arith.constant 0 : i32
    %c0_i32_0 = arith.constant 0 : i32
    return %arg0, %arg1, %c0_i32 : i32, i32, i32
  }
}

</mosaic_0001>

<bundles_post_ra>
// kernel: tpu_custom_call.1
= control target key start
LH: loop header
LB: loop body
LE: loop exit
PB: predicated region body
PF: predicated region fallthrough
CT: control target
= control target key end

     0   :  { %s1338_s12 = smov 0   ;;  %s1340_s13 = smov 0   ;;  %s1612_s0 = inlined_call_operand.vmem [shape: bf16[256,64], index: 0, kind: input, shape index: {}]   ;;  %s1613_s1 = inlined_call_operand.vmem [shape: bf16[3,64,72], index: 1, kind: input, shape index: {}]   ;;  %s1614_s2 = inlined_call_operand.vmem [shape: bf16[3,256,64], index: 2, kind: output, shape index: {0}]   ;;  %s1615_s3 = inlined_call_operand.vmem [shape: f32[3,256,8], index: 3, kind: output, shape index: {1}]  }
   0x1   :  { %s1342_s14 = smov 0  }
   0x2 LB: > { %s26_s15 = sadd.s32 1, %s1311_s13  ;;  %p1068_p0 = scmp.ge.s32.totalorder %s1315_s14, 1  ;;  %s1315_s14 = sphi %s1342_s14, %s14_s14   ;;  %s1311_s13 = sphi %s1340_s13, %s1617_s13   ;;  %s1307_s12 = sphi %s1338_s12, %s1616_s12  }
   0x3   : > { %p28_p1 = scmp.ge.s32.totalorder %s26_s15, 3  ;;  %p167_p2 = scmp.lt.s32.totalorder %s1315_s14, 4 }
   0x5   : > { %s1619_s15 = smov (%p28_p1, %s26_s15), 0  ;;  %p168_p3 = pnand %p1068_p0, %p167_p2 }
   0x6   : > { %p215_p4 = scmp.lt.s32.totalorder (!%p168_p3), %s1307_s12, 2  ;;  %v1277_v0 = vld [vmem:[%s1612_s0] sm:$0xff] (!%p168_p3)   ;;  %vm385_vm0 = vcmask (!%p168_p3), 523264   ;;  %v1279_v6 = vld [vmem:[%s1612_s0 + $0x8] sm:$0xff] (!%p168_p3)   ;;  %v1281_v8 = vld [vmem:[%s1612_s0 + $0x10] sm:$0xff] (!%p168_p3)   ;;  %vm723_vm1 = vcmask (!%p168_p3), 519168  }
   0x7   : > { %171 = sbr.rel (%p168_p3) target bundleno = 422 (0x1a6), region = 28  ;;  %v1278_v1 = vld [vmem:[%s1612_s0 + $0x40] sm:$0xff] (!%p168_p3)   ;;  %1208 = vmatprep.mubr.msk.bf16.mxu0 (!%p168_p3), %vm385_vm0, %v1277_v0  ;;  %v1280_v7 = vld [vmem:[%s1612_s0 + $0x48] sm:$0xff] (!%p168_p3)   ;;  %v1283_v9 = vld [vmem:[%s1612_s0 + $0x50] sm:$0xff] (!%p168_p3)   ;;  %s1317_s6 = smov (!%p168_p3), 64   ;;  %vm884_vm2 = vcmask (!%p168_p3), 64512  }
   0x8   : > { %1224 = vmatprep.mubr.msk.bf16.mxu1 (!%p168_p3), %vm385_vm0, %v1278_v1  ;;  %v1282_v10 = vld [vmem:[%s1612_s0 + $0x18] sm:$0xff] (!%p168_p3)   ;;  %v1285_v12 = vld [vmem:[%s1612_s0 + $0x20] sm:$0xff] (!%p168_p3)   ;;  %v1286_v14 = vld [vmem:[%s1612_s0 + $0x28] sm:$0xff] (!%p168_p3)  }
   0x9   : > { %v1284_v11 = vld [vmem:[%s1612_s0 + $0x58] sm:$0xff] (!%p168_p3)   ;;  %v1287_v13 = vld [vmem:[%s1612_s0 + $0x60] sm:$0xff] (!%p168_p3)   ;;  %v1288_v15 = vld [vmem:[%s1612_s0 + $0x68] sm:$0xff] (!%p168_p3)  }
   0xa   : > { %v1289_v16 = vld [vmem:[%s1612_s0 + $0x30] sm:$0xff] (!%p168_p3)   ;;  %v1290_v18 = vld [vmem:[%s1612_s0 + $0x38] sm:$0xff] (!%p168_p3)  }
   0xb   : > { %v1291_v17 = vld [vmem:[%s1612_s0 + $0x70] sm:$0xff] (!%p168_p3)   ;;  %v1292_v19 = vld [vmem:[%s1612_s0 + $0x78] sm:$0xff] (!%p168_p3)  }
   0xe   : > { %s1621_s12 = smov (!%p215_p4, %s1307_s12), 2 }
   0xf   : > { %s1145_s20 = sshll.u32 %s1621_s12, 5  ;;  %s1146_s29 = sshll.u32 %s1621_s12, 7 }
  0x10   : > { %s219_s23 = scalar_lea.vmem %s1613_s1, %s1145_s20  ;;  %s1430_s5 = scalar_lea.vmem %s1614_s2, %s1146_s29 }
  0x11   : > { %v1273_v2 = vld [vmem:[%s219_s23] sm:$0xff]   ;;  %v1274_v3 = vld [vmem:[%s219_s23 + $0x8] sm:$0xff]   ;;  %v1275_v4 = vld [vmem:[%s219_s23 + $0x10] sm:$0xff]   ;;  %s1147_s7 = sshll.u32 %s1621_s12, 8 }
  0x12   : > { %1200 = vmatprep.subr.bf16.mxu0 %v1273_v2  ;;  %1240 = vmatprep.subr.bf16.mxu1 %v1273_v2  ;;  %v1276_v5 = vld [vmem:[%s219_s23 + $0x18] sm:$0xff]   ;;  %s1537_s10 = scalar_lea.vmem %s1615_s3, %s1147_s7 }
  0x13   : > { %1201 = vmatpush3.bf16.msra.mxu0 %v1273_v2  ;;  %1244 = vmatpush3.bf16.msra.mxu1 %v1273_v2 }
  0x14   : > { %1202 = vmatprep.subr.bf16.mxu0 %v1274_v3  ;;  %1241 = vmatprep.subr.bf16.mxu1 %v1274_v3 }
  0x17   : > { %1203 = vmatpush3.bf16.msra.mxu0 %v1274_v3  ;;  %1245 = vmatpush3.bf16.msra.mxu1 %v1274_v3 }
  0x18   : > { %1204 = vmatprep.subr.bf16.mxu0 %v1275_v4  ;;  %1242 = vmatprep.subr.bf16.mxu1 %v1275_v4 }
  0x1b   : > { %1205 = vmatpush3.bf16.msra.mxu0 %v1275_v4  ;;  %1246 = vmatpush3.bf16.msra.mxu1 %v1275_v4 }
  0x1c   : > { %1206 = vmatprep.subr.bf16.mxu0 %v1276_v5  ;;  %1243 = vmatprep.subr.bf16.mxu1 %v1276_v5 }
  0x1f   : > { %1207 = vmatpush3.bf16.msra.mxu0 %v1276_v5  ;;  %1247 = vmatpush3.bf16.msra.mxu1 %v1276_v5 }
  0x22   : > { %1209 = vmatmul.mubr.msk.bf16.vlgmr.msra.gmra.mrb[0].mxu0 %vm385_vm0, %v1279_v6  ;;  %1225 = vmatmul.mubr.msk.bf16.vlgmr.msra.gmra.mrb[0].mxu1 %vm385_vm0, %v1280_v7 }
  0x23   : > { %1212 = vmatprep.mubr.msk.bf16.mxu0 %vm385_vm0, %v1281_v8  ;;  %1228 = vmatprep.mubr.msk.bf16.mxu1 %vm385_vm0, %v1283_v9 }
  0x2a   : > { %1213 = vmatmul.mubr.msk.bf16.gmra.mrb[4].mxu0 %vm385_vm0, %v1282_v10  ;;  %1229 = vmatmul.mubr.msk.bf16.gmra.mrb[4].mxu1 %vm385_vm0, %v1284_v11 }
  0x2b   : > { %1216 = vmatprep.mubr.msk.bf16.mxu0 %vm385_vm0, %v1285_v12  ;;  %1232 = vmatprep.mubr.msk.bf16.mxu1 %vm385_vm0, %v1287_v13 }
  0x32   : > { %1217 = vmatmul.mubr.msk.bf16.gmra.mrb[8].mxu0 %vm385_vm0, %v1286_v14  ;;  %1233 = vmatmul.mubr.msk.bf16.gmra.mrb[8].mxu1 %vm385_vm0, %v1288_v15 }
  0x33   : > { %1220 = vmatprep.mubr.msk.bf16.mxu0 %vm385_vm0, %v1289_v16  ;;  %1236 = vmatprep.mubr.msk.bf16.mxu1 %vm385_vm0, %v1291_v17 }
  0x3a   : > { %1221 = vmatmul.mubr.msk.bf16.gmra.mrb[12].mxu0 %vm385_vm0, %v1290_v18  ;;  %1237 = vmatmul.mubr.msk.bf16.gmra.mrb[12].mxu1 %vm385_vm0, %v1292_v19 }
  0xf5   : > { %v1210_v20 = vpop.f32.mrb[0].mxu0  ;;  %v1226_v21 = vpop.f32.mrb[0].mxu1 }
  0xf6   : > { %v1150_v22 = vpack.c.bf16 %v1210_v20, %v1210_v20  ;;  %v1166_v23 = vpack.c.bf16 %v1226_v21, %v1226_v21  ;;  %824 = vrot.lane.b32.xlu0 %v1226_v21, %s1317_s6  ;;  %v532_v24 = vpop.f32.mrb[1].mxu1  ;;  %792 = vrot.lane.b32.xlu1 %v1210_v20, %s1317_s6  ;;  %v468_v25 = vpop.f32.mrb[1].mxu0 }
  0xf7   : > { %v1164_v26 = vpack.c.bf16 %v532_v24, %v532_v24  ;;  %v1148_v27 = vpack.c.bf16 %v468_v25, %v468_v25  ;;  %v1211_v28 = vpop.f32.mrb[2].mxu0  ;;  %v1227_v29 = vpop.f32.mrb[2].mxu1 }
  0xf8   : > { %726 = vst.msk [vmem:[%s1430_s5 + $0x8] sm:$0xf] %vm723_vm1, %v1150_v22  ;;  %742 = vst.msk [vmem:[%s1430_s5 + $0x48] sm:$0xf] %vm723_vm1, %v1166_v23  ;;  %v1151_v30 = vpack.c.bf16 %v1211_v28, %v1211_v28  ;;  %v1167_v31 = vpack.c.bf16 %v1227_v29, %v1227_v29  ;;  %v471_v32 = vpop.f32.mrb[3].mxu0  ;;  %v535_v33 = vpop.f32.mrb[3].mxu1 }
  0xf9   : > { %740 = vst.msk [vmem:[%s1430_s5 + $0x40] sm:$0xf] %vm723_vm1, %v1164_v26  ;;  %724 = vst.msk [vmem:[%s1430_s5] sm:$0xf] %vm723_vm1, %v1148_v27  ;;  %v1149_v34 = vpack.c.bf16 %v471_v32, %v471_v32  ;;  %v1165_v35 = vpack.c.bf16 %v535_v33, %v535_v33 }
  0xfa   : > { %727 = vst.msk [vmem:[%s1430_s5 + $0xc] sm:$0xf] %vm723_vm1, %v1151_v30  ;;  %743 = vst.msk [vmem:[%s1430_s5 + $0x4c] sm:$0xf] %vm723_vm1, %v1167_v31  ;;  %788 = vrot.lane.b32.xlu0 %v468_v25, %s1317_s6  ;;  %794 = vrot.lane.b32.xlu1 %v1211_v28, %s1317_s6 }
  0xfb   : > { %725 = vst.msk [vmem:[%s1430_s5 + $0x4] sm:$0xf] %vm723_vm1, %v1149_v34  ;;  %741 = vst.msk [vmem:[%s1430_s5 + $0x44] sm:$0xf] %vm723_vm1, %v1165_v35 }
  0xfd   : > { %v1214_v36 = vpop.f32.mrb[4].mxu0  ;;  %v1230_v37 = vpop.f32.mrb[4].mxu1 }
  0xfe   : > { %820 = vrot.lane.b32.xlu0 %v532_v24, %s1317_s6  ;;  %826 = vrot.lane.b32.xlu1 %v1227_v29, %s1317_s6  ;;  %v1154_v38 = vpack.c.bf16 %v1214_v36, %v1214_v36  ;;  %v484_v39 = vpop.f32.mrb[5].mxu0  ;;  %v1170_v40 = vpack.c.bf16 %v1230_v37, %v1230_v37  ;;  %v1454_v41 = vpop.f32.mrb[5].mxu1 }
  0xff   : > { %v1152_v42 = vpack.c.bf16 %v484_v39, %v484_v39  ;;  %v1215_v43 = vpop.f32.mrb[6].mxu0  ;;  %v1168_v44 = vpack.c.bf16 %v1454_v41, %v1454_v41  ;;  %v1231_v45 = vpop.f32.mrb[6].mxu1 }
 0x100   : > { %730 = vst.msk [vmem:[%s1430_s5 + $0x18] sm:$0xf] %vm723_vm1, %v1154_v38  ;;  %v1155_v46 = vpack.c.bf16 %v1215_v43, %v1215_v43  ;;  %v487_v47 = vpop.f32.mrb[7].mxu0  ;;  %746 = vst.msk [vmem:[%s1430_s5 + $0x58] sm:$0xf] %vm723_vm1, %v1170_v40  ;;  %v1171_v48 = vpack.c.bf16 %v1231_v45, %v1231_v45  ;;  %v551_v49 = vpop.f32.mrb[7].mxu1 }
 0x101   : > { %728 = vst.msk [vmem:[%s1430_s5 + $0x10] sm:$0xf] %vm723_vm1, %v1152_v42  ;;  %v1153_v50 = vpack.c.bf16 %v487_v47, %v487_v47  ;;  %744 = vst.msk [vmem:[%s1430_s5 + $0x50] sm:$0xf] %vm723_vm1, %v1168_v44  ;;  %v1169_v51 = vpack.c.bf16 %v551_v49, %v551_v49 }
 0x102   : > { %822 = vrot.lane.b32.xlu1 %v535_v33, %s1317_s6  ;;  %790 = vrot.lane.b32.xlu0 %v471_v32, %s1317_s6  ;;  %731 = vst.msk [vmem:[%s1430_s5 + $0x1c] sm:$0xf] %vm723_vm1, %v1155_v46  ;;  %747 = vst.msk [vmem:[%s1430_s5 + $0x5c] sm:$0xf] %vm723_vm1, %v1171_v48 }
 0x103   : > { %729 = vst.msk [vmem:[%s1430_s5 + $0x14] sm:$0xf] %vm723_vm1, %v1153_v50  ;;  %745 = vst.msk [vmem:[%s1430_s5 + $0x54] sm:$0xf] %vm723_vm1, %v1169_v51 }
 0x105   : > { %v1218_v52 = vpop.f32.mrb[8].mxu0  ;;  %v1234_v53 = vpop.f32.mrb[8].mxu1 }
 0x106   : > { %800 = vrot.lane.b32.xlu0 %v1214_v36, %s1317_s6  ;;  %802 = vrot.lane.b32.xlu1 %v1215_v43, %s1317_s6  ;;  %v1158_v54 = vpack.c.bf16 %v1218_v52, %v1218_v52  ;;  %v500_v55 = vpop.f32.mrb[9].mxu0  ;;  %v1174_v56 = vpack.c.bf16 %v1234_v53, %v1234_v53  ;;  %v564_v57 = vpop.f32.mrb[9].mxu1 }
 0x107   : > { %v1156_v58 = vpack.c.bf16 %v500_v55, %v500_v55  ;;  %v1219_v59 = vpop.f32.mrb[10].mxu0  ;;  %v1172_v60 = vpack.c.bf16 %v564_v57, %v564_v57  ;;  %v1235_v61 = vpop.f32.mrb[10].mxu1 }
 0x108   : > { %734 = vst.msk [vmem:[%s1430_s5 + $0x28] sm:$0xf] %vm723_vm1, %v1158_v54  ;;  %v1159_v62 = vpack.c.bf16 %v1219_v59, %v1219_v59  ;;  %v503_v63 = vpop.f32.mrb[11].mxu0  ;;  %750 = vst.msk [vmem:[%s1430_s5 + $0x68] sm:$0xf] %vm723_vm1, %v1174_v56  ;;  %v1175_v0 = vpack.c.bf16 %v1235_v61, %v1235_v61  ;;  %v567_v1 = vpop.f32.mrb[11].mxu1 }
 0x109   : > { %732 = vst.msk [vmem:[%s1430_s5 + $0x20] sm:$0xf] %vm723_vm1, %v1156_v58  ;;  %v1157_v2 = vpack.c.bf16 %v503_v63, %v503_v63  ;;  %748 = vst.msk [vmem:[%s1430_s5 + $0x60] sm:$0xf] %vm723_vm1, %v1172_v60  ;;  %v1173_v3 = vpack.c.bf16 %v567_v1, %v567_v1 }
 0x10a   : > { %832 = vrot.lane.b32.xlu0 %v1230_v37, %s1317_s6  ;;  %834 = vrot.lane.b32.xlu1 %v1231_v45, %s1317_s6  ;;  %735 = vst.msk [vmem:[%s1430_s5 + $0x2c] sm:$0xf] %vm723_vm1, %v1159_v62  ;;  %751 = vst.msk [vmem:[%s1430_s5 + $0x6c] sm:$0xf] %vm723_vm1, %v1175_v0 }
 0x10b   : > { %733 = vst.msk [vmem:[%s1430_s5 + $0x24] sm:$0xf] %vm723_vm1, %v1157_v2  ;;  %749 = vst.msk [vmem:[%s1430_s5 + $0x64] sm:$0xf] %vm723_vm1, %v1173_v3 }
 0x10d   : > { %v1222_v4 = vpop.f32.mrb[12].mxu0  ;;  %v1238_v5 = vpop.f32.mrb[12].mxu1 }
 0x10e   : > { %796 = vrot.lane.b32.xlu0 %v484_v39, %s1317_s6  ;;  %798 = vrot.lane.b32.xlu1 %v487_v47, %s1317_s6  ;;  %v1162_v6 = vpack.c.bf16 %v1222_v4, %v1222_v4  ;;  %v516_v7 = vpop.f32.mrb[13].mxu0  ;;  %v1178_v8 = vpack.c.bf16 %v1238_v5, %v1238_v5  ;;  %v580_v9 = vpop.f32.mrb[13].mxu1 }
 0x10f   : > { %v1160_v10 = vpack.c.bf16 %v516_v7, %v516_v7  ;;  %v1223_v11 = vpop.f32.mrb[14].mxu0  ;;  %v1176_v12 = vpack.c.bf16 %v580_v9, %v580_v9  ;;  %v1239_v13 = vpop.f32.mrb[14].mxu1 }
 0x110   : > { %738 = vst.msk [vmem:[%s1430_s5 + $0x38] sm:$0xf] %vm723_vm1, %v1162_v6  ;;  %v1163_v14 = vpack.c.bf16 %v1223_v11, %v1223_v11  ;;  %v519_v15 = vpop.f32.mrb[15].mxu0  ;;  %754 = vst.msk [vmem:[%s1430_s5 + $0x78] sm:$0xf] %vm723_vm1, %v1178_v8  ;;  %v1179_v16 = vpack.c.bf16 %v1239_v13, %v1239_v13  ;;  %v583_v17 = vpop.f32.mrb[15].mxu1 }
 0x111   : > { %736 = vst.msk [vmem:[%s1430_s5 + $0x30] sm:$0xf] %vm723_vm1, %v1160_v10  ;;  %v1161_v18 = vpack.c.bf16 %v519_v15, %v519_v15  ;;  %752 = vst.msk [vmem:[%s1430_s5 + $0x70] sm:$0xf] %vm723_vm1, %v1176_v12  ;;  %v1177_v19 = vpack.c.bf16 %v583_v17, %v583_v17 }
 0x112   : > { %828 = vrot.lane.b32.xlu0 %v1454_v41, %s1317_s6  ;;  %830 = vrot.lane.b32.xlu1 %v551_v49, %s1317_s6  ;;  %739 = vst.msk [vmem:[%s1430_s5 + $0x3c] sm:$0xf] %vm723_vm1, %v1163_v14  ;;  %755 = vst.msk [vmem:[%s1430_s5 + $0x7c] sm:$0xf] %vm723_vm1, %v1179_v16 }
 0x113   : > { %737 = vst.msk [vmem:[%s1430_s5 + $0x34] sm:$0xf] %vm723_vm1, %v1161_v18  ;;  %753 = vst.msk [vmem:[%s1430_s5 + $0x74] sm:$0xf] %vm723_vm1, %v1177_v19 }
 0x116   : > { %808 = vrot.lane.b32.xlu0 %v1218_v52, %s1317_s6  ;;  %810 = vrot.lane.b32.xlu1 %v1219_v59, %s1317_s6 }
 0x11a   : > { %840 = vrot.lane.b32.xlu0 %v1234_v53, %s1317_s6  ;;  %842 = vrot.lane.b32.xlu1 %v1235_v61, %s1317_s6 }
 0x11e   : > { %804 = vrot.lane.b32.xlu0 %v500_v55, %s1317_s6  ;;  %806 = vrot.lane.b32.xlu1 %v503_v63, %s1317_s6 }
 0x122   : > { %836 = vrot.lane.b32.xlu0 %v564_v57, %s1317_s6  ;;  %838 = vrot.lane.b32.xlu1 %v567_v1, %s1317_s6 }
 0x126   : > { %816 = vrot.lane.b32.xlu0 %v1222_v4, %s1317_s6  ;;  %818 = vrot.lane.b32.xlu1 %v1223_v11, %s1317_s6 }
 0x12a   : > { %812 = vrot.lane.b32.xlu0 %v516_v7, %s1317_s6  ;;  %814 = vrot.lane.b32.xlu1 %v519_v15, %s1317_s6 }
 0x12e   : > { %844 = vrot.lane.b32.xlu0 %v580_v9, %s1317_s6  ;;  %846 = vrot.lane.b32.xlu1 %v583_v17, %s1317_s6 }
 0x132   : > { %848 = vrot.lane.b32.xlu0 %v1238_v5, %s1317_s6  ;;  %850 = vrot.lane.b32.xlu1 %v1239_v13, %s1317_s6 }
 0x168   : > { %v825_v20 = vpop.permute.xlu0 %824  ;;  %v793_v21 = vpop.permute.xlu1 %792 }
 0x169   : > { %903 = vst.msk [vmem:[%s1537_s10 + $0x90] sm:$0xff] %vm884_vm2, %v825_v20  ;;  %887 = vst.msk [vmem:[%s1537_s10 + $0x10] sm:$0xff] %vm884_vm2, %v793_v21 }
 0x16c   : > { %v789_v22 = vpop.permute.xlu0 %788  ;;  %v795_v23 = vpop.permute.xlu1 %794 }
 0x16d   : > { %885 = vst.msk [vmem:[%s1537_s10] sm:$0xff] %vm884_vm2, %v789_v22  ;;  %888 = vst.msk [vmem:[%s1537_s10 + $0x18] sm:$0xff] %vm884_vm2, %v795_v23 }
 0x170   : > { %v821_v24 = vpop.permute.xlu0 %820  ;;  %v827_v25 = vpop.permute.xlu1 %826 }
 0x171   : > { %901 = vst.msk [vmem:[%s1537_s10 + $0x80] sm:$0xff] %vm884_vm2, %v821_v24  ;;  %904 = vst.msk [vmem:[%s1537_s10 + $0x98] sm:$0xff] %vm884_vm2, %v827_v25 }
 0x174   : > { %v823_v26 = vpop.permute.xlu1 %822  ;;  %v791_v27 = vpop.permute.xlu0 %790 }
 0x175   : > { %902 = vst.msk [vmem:[%s1537_s10 + $0x88] sm:$0xff] %vm884_vm2, %v823_v26  ;;  %886 = vst.msk [vmem:[%s1537_s10 + $0x8] sm:$0xff] %vm884_vm2, %v791_v27 }
 0x178   : > { %v801_v28 = vpop.permute.xlu0 %800  ;;  %v803_v29 = vpop.permute.xlu1 %802 }
 0x179   : > { %891 = vst.msk [vmem:[%s1537_s10 + $0x30] sm:$0xff] %vm884_vm2, %v801_v28  ;;  %892 = vst.msk [vmem:[%s1537_s10 + $0x38] sm:$0xff] %vm884_vm2, %v803_v29 }
 0x17c   : > { %v833_v30 = vpop.permute.xlu0 %832  ;;  %v835_v31 = vpop.permute.xlu1 %834 }
 0x17d   : > { %907 = vst.msk [vmem:[%s1537_s10 + $0xb0] sm:$0xff] %vm884_vm2, %v833_v30  ;;  %908 = vst.msk [vmem:[%s1537_s10 + $0xb8] sm:$0xff] %vm884_vm2, %v835_v31 }
 0x180   : > { %v797_v32 = vpop.permute.xlu0 %796  ;;  %v799_v33 = vpop.permute.xlu1 %798 }
 0x181   : > { %889 = vst.msk [vmem:[%s1537_s10 + $0x20] sm:$0xff] %vm884_vm2, %v797_v32  ;;  %890 = vst.msk [vmem:[%s1537_s10 + $0x28] sm:$0xff] %vm884_vm2, %v799_v33 }
 0x184   : > { %v829_v34 = vpop.permute.xlu0 %828  ;;  %v831_v35 = vpop.permute.xlu1 %830 }
 0x185   : > { %905 = vst.msk [vmem:[%s1537_s10 + $0xa0] sm:$0xff] %vm884_vm2, %v829_v34  ;;  %906 = vst.msk [vmem:[%s1537_s10 + $0xa8] sm:$0xff] %vm884_vm2, %v831_v35 }
 0x188   : > { %v809_v36 = vpop.permute.xlu0 %808  ;;  %v811_v37 = vpop.permute.xlu1 %810 }
 0x189   : > { %895 = vst.msk [vmem:[%s1537_s10 + $0x50] sm:$0xff] %vm884_vm2, %v809_v36  ;;  %896 = vst.msk [vmem:[%s1537_s10 + $0x58] sm:$0xff] %vm884_vm2, %v811_v37 }
 0x18c   : > { %v841_v38 = vpop.permute.xlu0 %840  ;;  %v843_v39 = vpop.permute.xlu1 %842 }
 0x18d   : > { %911 = vst.msk [vmem:[%s1537_s10 + $0xd0] sm:$0xff] %vm884_vm2, %v841_v38  ;;  %912 = vst.msk [vmem:[%s1537_s10 + $0xd8] sm:$0xff] %vm884_vm2, %v843_v39 }
 0x190   : > { %v805_v40 = vpop.permute.xlu0 %804  ;;  %v807_v41 = vpop.permute.xlu1 %806 }
 0x191   : > { %893 = vst.msk [vmem:[%s1537_s10 + $0x40] sm:$0xff] %vm884_vm2, %v805_v40  ;;  %894 = vst.msk [vmem:[%s1537_s10 + $0x48] sm:$0xff] %vm884_vm2, %v807_v41 }
 0x194   : > { %v837_v42 = vpop.permute.xlu0 %836  ;;  %v839_v43 = vpop.permute.xlu1 %838 }
 0x195   : > { %909 = vst.msk [vmem:[%s1537_s10 + $0xc0] sm:$0xff] %vm884_vm2, %v837_v42  ;;  %910 = vst.msk [vmem:[%s1537_s10 + $0xc8] sm:$0xff] %vm884_vm2, %v839_v43 }
 0x198   : > { %v817_v44 = vpop.permute.xlu0 %816  ;;  %v819_v45 = vpop.permute.xlu1 %818 }
 0x199   : > { %899 = vst.msk [vmem:[%s1537_s10 + $0x70] sm:$0xff] %vm884_vm2, %v817_v44  ;;  %900 = vst.msk [vmem:[%s1537_s10 + $0x78] sm:$0xff] %vm884_vm2, %v819_v45 }
 0x19c   : > { %v813_v46 = vpop.permute.xlu0 %812  ;;  %v815_v47 = vpop.permute.xlu1 %814 }
 0x19d   : > { %897 = vst.msk [vmem:[%s1537_s10 + $0x60] sm:$0xff] %vm884_vm2, %v813_v46  ;;  %898 = vst.msk [vmem:[%s1537_s10 + $0x68] sm:$0xff] %vm884_vm2, %v815_v47 }
 0x1a0   : > { %v845_v48 = vpop.permute.xlu0 %844  ;;  %v847_v49 = vpop.permute.xlu1 %846 }
 0x1a1   : > { %913 = vst.msk [vmem:[%s1537_s10 + $0xe0] sm:$0xff] %vm884_vm2, %v845_v48  ;;  %914 = vst.msk [vmem:[%s1537_s10 + $0xe8] sm:$0xff] %vm884_vm2, %v847_v49 }
 0x1a4   : > { %v849_v50 = vpop.permute.xlu0 %848  ;;  %v851_v51 = vpop.permute.xlu1 %850 }
 0x1a5   : > { %915 = vst.msk [vmem:[%s1537_s10 + $0xf0] sm:$0xff] %vm884_vm2, %v849_v50  ;;  %916 = vst.msk [vmem:[%s1537_s10 + $0xf8] sm:$0xff] %vm884_vm2, %v851_v51 }
 0x1a6 PF: > { %s14_s14 = sadd.s32 1, %s1315_s14   ;;  %s1616_s12 = smov %s1311_s13 }
 0x1a7   : > { %p11_p5 = scmp.ge.s32.totalorder %s14_s14, 5   ;;  %s1617_s13 = smov %s1619_s15 }
 0x1a9   :  { %13 = sbr.rel (!%p11_p5) target bundleno = 2 (0x2), region = 73 }

</bundles_post_ra>
